<compile_context>
chip_gen: v6e
topology: v6e:2x2x1
jax: 0.10.0
libtpu: 0.0.40
codegen_flags: <defaults>
</compile_context>

<pallas_src>
import functools

import jax
import jax.numpy as jnp
from jax.experimental import pallas as pl
from jax.experimental.pallas import tpu as pltpu


def selfattn_kernel(x_ref, w_ref, bw_ref, v_ref, bv_ref, o_ref):
    bt, s, d = x_ref.shape
    x3 = x_ref[...]                                   # (bt, S, D)
    x2 = x3.reshape(bt * s, d)                        # merge leading dims (free when S%8==0)

    # energy = tanh(x @ W + bW): one (bt*S, D) x (D, H) MXU matmul, f32 accum.
    energy2 = jnp.tanh(
        jnp.dot(x2, w_ref[...], preferred_element_type=jnp.float32)
        + bw_ref[...]                                 # (1, H) broadcast
    )                                                 # (bt*S, H)

    # scores = energy @ V + bV as a VPU multiply + lane reduction over H
    # (avoids an N=1 MXU matmul); only the (bt*S, 1) result is reshaped.
    scores2 = (
        jnp.sum(energy2 * v_ref[...], axis=-1, keepdims=True)   # (bt*S, 1)
        + bv_ref[0]                                             # SMEM scalar
    )
    scores = scores2.reshape(bt, s, 1)                # (bt, S, 1)

    # softmax over the sequence axis, independently per batch element.
    m = jnp.max(scores, axis=1, keepdims=True)        # (bt, 1, 1)
    e = jnp.exp(scores - m)
    denom = jnp.sum(e, axis=1, keepdims=True)         # (bt, 1, 1)
    weights = e / denom                               # exact normalization

    out3 = (weights * x3).astype(o_ref.dtype)         # (bt, S, D)
    # Lane-dense store: relayout to (1, bt, S*D) in VMEM (cheap) so the HBM
    # store path uses full-width unmasked vst instead of D=32 masked stores.
    o_ref[...] = out3.reshape(o_ref.shape)


def _vmem_budget():
    """(vmem_limit_bytes, per-block byte target), generation-aware."""
    try:
        cap = int(pltpu.get_tpu_info().vmem_capacity_bytes)
    except Exception:
        cap = 64 * 1024 * 1024                        # conservative (v7x) fallback
    # ~70% of physical for the scoped limit, capped well below any generation.
    vmem_limit = max(32 * 1024 * 1024, min(int(cap * 0.7), 100 * 1024 * 1024))
    # 2x in + 2x out double buffers = 4 live blocks, plus weights + scratch
    # headroom -> budget roughly vmem_limit / 10 per block (1..16 MiB).
    block_target = max(1 * 1024 * 1024, min(16 * 1024 * 1024, vmem_limit // 10))
    return vmem_limit, block_target


def _pick_block_batch(B, S, D, itemsize, block_target_bytes):
    """Batch-tile so one (bt, S, D) block hits the byte target (HBM-bound)."""
    per_batch_bytes = max(S * D * itemsize, 1)
    bt = max(1, block_target_bytes // per_batch_bytes)
    if B >= 2:
        # Keep >= 2 grid steps so both v7x TensorCores get work on the
        # "parallel" axis (a no-op cost on single-TC v5e/v6e).
        bt = min(bt, B // 2)
    return int(max(1, min(bt, B)))


@functools.partial(jax.jit, static_argnums=())
def self_attention(x, w, bw, v, bv):
    """x: (B, S, D); w: (D, H); bw: (H,); v: (H, 1); bv: scalar array ()."""
    B, S, D = x.shape
    H = w.shape[1]

    bw2 = bw.reshape(1, H)
    v2 = v.reshape(1, H)            # (H, 1) -> (1, H) row for the VPU reduction
    bv1 = bv.reshape(1)             # scalar in SMEM

    vmem_limit, block_target = _vmem_budget()
    bt = _pick_block_batch(B, S, D, x.dtype.itemsize, block_target)

    # Pad B up to a multiple of bt (no divisor search / no tiny blocks).
    G = -(-B // bt)                 # ceil div = number of grid steps
    B_pad = G * bt
    x_in = x if B_pad == B else jnp.pad(x, ((0, B_pad - B), (0, 0), (0, 0)))

    out_flat = pl.pallas_call(
        selfattn_kernel,
        out_shape=jax.ShapeDtypeStruct((G, bt, S * D), x.dtype),
        grid_spec=pltpu.PrefetchScalarGridSpec(
            num_scalar_prefetch=0,
            grid=(G,),
            in_specs=[
                pl.BlockSpec((bt, S, D), lambda b: (b, 0, 0)),       # x, bt batches/step
                pl.BlockSpec((D, H), lambda b: (0, 0)),              # W (resident)
                pl.BlockSpec((1, H), lambda b: (0, 0)),              # bW row
                pl.BlockSpec((1, H), lambda b: (0, 0)),              # V row
                pl.BlockSpec(memory_space=pltpu.MemorySpace.SMEM),   # bV scalar
            ],
            out_specs=pl.BlockSpec((1, bt, S * D), lambda b: (b, 0, 0)),
        ),
        compiler_params=pltpu.CompilerParams(
            dimension_semantics=("parallel",),
            vmem_limit_bytes=vmem_limit,
        ),
    )(x_in, w, bw2, v2, bv1)

    # Contiguous reshape back + strip any batch padding (both free/cheap).
    return out_flat.reshape(B_pad, S, D)[:B]


def reference(x, w, bw, v, bv):
    energy = jnp.tanh(
        jnp.einsum("bsd,dh->bsh", x, w, precision=jax.lax.Precision.HIGHEST) + bw
    )
    scores = jnp.einsum(
        "bsh,ho->bso", energy, v, precision=jax.lax.Precision.HIGHEST
    ) + bv
    weights = jax.nn.softmax(scores, axis=1)
    return weights * x


if __name__ == "__main__":
    B, S, D, H = 2, 8, 32, 32

    key = jax.random.PRNGKey(0)
    kx, kw, kbw, kv, kbv = jax.random.split(key, 5)

    x = jax.random.normal(kx, (B, S, D), dtype=jnp.float32)

    # Deterministic parameter init (PyTorch-Linear-style uniform bounds).
    bound_w = 1.0 / (D ** 0.5)
    bound_v = 1.0 / (H ** 0.5)
    w = jax.random.uniform(kw, (D, H), jnp.float32, -bound_w, bound_w)
    bw = jax.random.uniform(kbw, (H,), jnp.float32, -bound_w, bound_w)
    v = jax.random.uniform(kv, (H, 1), jnp.float32, -bound_v, bound_v)
    bv = jax.random.uniform(kbv, (), jnp.float32, -bound_v, bound_v)

    out = self_attention(x, w, bw, v, bv)
    out = jax.block_until_ready(out)

    ref = reference(x, w, bw, v, bv)
    assert out.shape == (B, S, D)
    # Exact softmax normalization + f32 MXU accumulation -> tight agreement.
    assert jnp.allclose(out, ref, atol=2e-5, rtol=2e-5), "mismatch vs reference"

    print("KERNEL_OK")
</pallas_src>

<mosaic_0001>
module attributes {stable_mosaic.version = 11 : i64} {
  func.func @selfattn_kernel(%arg0: i32, %arg1: memref<1x8x32xf32, #tpu.memory_space<vmem>>, %arg2: memref<32x32xf32, #tpu.memory_space<vmem>>, %arg3: memref<1x32xf32, #tpu.memory_space<vmem>>, %arg4: memref<1x32xf32, #tpu.memory_space<vmem>>, %arg5: memref<1xf32, #tpu.memory_space<smem>>, %arg6: memref<1x1x256xf32, #tpu.memory_space<vmem>>) attributes {dimension_semantics = [#tpu.dimension_semantics<parallel>], iteration_bounds = array<i64: 2>, scalar_prefetch = 0 : i64, scratch_operands = 0 : i64, tpu.core_type = #tpu.core_type<tc>, window_params = [{transform_indices = @transform_0, window_bounds = array<i64: 1, 8, 32>}, {pipeline_mode = #tpu.pipeline_mode<synchronous>, transform_indices = @transform_1, window_bounds = array<i64: 32, 32>}, {pipeline_mode = #tpu.pipeline_mode<synchronous>, transform_indices = @transform_2, window_bounds = array<i64: 1, 32>}, {pipeline_mode = #tpu.pipeline_mode<synchronous>, transform_indices = @transform_3, window_bounds = array<i64: 1, 32>}, {transform_indices = @transform_4, window_bounds = array<i64: 1>}, {transform_indices = @transform_5, window_bounds = array<i64: 1, 1, 256>}]} {
    %c0 = arith.constant 0 : index
    %c0_0 = arith.constant 0 : index
    %c0_1 = arith.constant 0 : index
    %0 = vector.load %arg1[%c0, %c0_0, %c0_1] : memref<1x8x32xf32, #tpu.memory_space<vmem>>, vector<1x8x32xf32>
    %1 = vector.shape_cast %0 : vector<1x8x32xf32> to vector<8x32xf32>
    %c0_2 = arith.constant 0 : index
    %c0_3 = arith.constant 0 : index
    %2 = vector.load %arg2[%c0_2, %c0_3] : memref<32x32xf32, #tpu.memory_space<vmem>>, vector<32x32xf32>
    %cst = arith.constant dense<0.000000e+00> : vector<8x32xf32>
    %3 = tpu.matmul %1, %2, %cst {dimension_numbers = #tpu.dot_dimension_numbers<[1], [0], [0], [1], [0, 0, 1, 1], [], []>} : vector<8x32xf32>, vector<32x32xf32>, vector<8x32xf32> -> vector<8x32xf32>
    %c0_4 = arith.constant 0 : index
    %c0_5 = arith.constant 0 : index
    %4 = vector.load %arg3[%c0_4, %c0_5] : memref<1x32xf32, #tpu.memory_space<vmem>>, vector<1x32xf32>
    %5 = vector.broadcast %4 : vector<1x32xf32> to vector<8x32xf32>
    %6 = arith.addf %3, %5 : vector<8x32xf32>
    %7 = math.tanh %6 : vector<8x32xf32>
    %c0_6 = arith.constant 0 : index
    %c0_7 = arith.constant 0 : index
    %8 = vector.load %arg4[%c0_6, %c0_7] : memref<1x32xf32, #tpu.memory_space<vmem>>, vector<1x32xf32>
    %9 = vector.broadcast %8 : vector<1x32xf32> to vector<8x32xf32>
    %10 = arith.mulf %7, %9 : vector<8x32xf32>
    %cst_8 = arith.constant dense<0.000000e+00> : vector<8xf32>
    %11 = vector.multi_reduction <add>, %10, %cst_8 [1] : vector<8x32xf32> to vector<8xf32>
    %12 = vector.shape_cast %11 : vector<8xf32> to vector<8x1xf32>
    %c0_9 = arith.constant 0 : index
    %13 = memref.load %arg5[%c0_9] : memref<1xf32, #tpu.memory_space<smem>>
    %14 = vector.broadcast %13 : f32 to vector<8x1xf32>
    %15 = arith.addf %12, %14 : vector<8x1xf32>
    %16 = vector.shape_cast %15 : vector<8x1xf32> to vector<1x8x1xf32>
    %cst_10 = arith.constant dense<0xFF800000> : vector<1x1xf32>
    %17 = vector.multi_reduction <maximumf>, %16, %cst_10 [1] : vector<1x8x1xf32> to vector<1x1xf32>
    %18 = vector.shape_cast %17 : vector<1x1xf32> to vector<1x1x1xf32>
    %19 = vector.broadcast %18 : vector<1x1x1xf32> to vector<1x8x1xf32>
    %20 = arith.subf %16, %19 : vector<1x8x1xf32>
    %21 = math.exp %20 : vector<1x8x1xf32>
    %cst_11 = arith.constant dense<0.000000e+00> : vector<1x1xf32>
    %22 = vector.multi_reduction <add>, %21, %cst_11 [1] : vector<1x8x1xf32> to vector<1x1xf32>
    %23 = vector.shape_cast %22 : vector<1x1xf32> to vector<1x1x1xf32>
    %24 = vector.broadcast %23 : vector<1x1x1xf32> to vector<1x8x1xf32>
    %25 = arith.divf %21, %24 : vector<1x8x1xf32>
    %26 = vector.broadcast %25 : vector<1x8x1xf32> to vector<1x8x32xf32>
    %27 = arith.mulf %26, %0 : vector<1x8x32xf32>
    %28 = vector.shape_cast %27 : vector<1x8x32xf32> to vector<1x1x256xf32>
    %c0_12 = arith.constant 0 : index
    %c0_13 = arith.constant 0 : index
    %c0_14 = arith.constant 0 : index
    %29 = vector.load %arg6[%c0_12, %c0_13, %c0_14] : memref<1x1x256xf32, #tpu.memory_space<vmem>>, vector<1x1x256xf32>
    tpu.vector_store %arg6[%c0_12, %c0_13, %c0_14], %28 {strides = array<i32>} : memref<1x1x256xf32, #tpu.memory_space<vmem>>, vector<1x1x256xf32>,
    return
  }
  func.func @transform_0(%arg0: i32) -> (i32, i32, i32) {
    %c0_i32 = arith.constant 0 : i32
    %c0_i32_0 = arith.constant 0 : i32
    %c0_i32_1 = arith.constant 0 : i32
    return %arg0, %c0_i32, %c0_i32_0 : i32, i32, i32
  }
  func.func @transform_1(%arg0: i32) -> (i32, i32) {
    %c0_i32 = arith.constant 0 : i32
    %c0_i32_0 = arith.constant 0 : i32
    %c0_i32_1 = arith.constant 0 : i32
    return %c0_i32, %c0_i32_0 : i32, i32
  }
  func.func @transform_2(%arg0: i32) -> (i32, i32) {
    %c0_i32 = arith.constant 0 : i32
    %c0_i32_0 = arith.constant 0 : i32
    %c0_i32_1 = arith.constant 0 : i32
    return %c0_i32, %c0_i32_0 : i32, i32
  }
  func.func @transform_3(%arg0: i32) -> (i32, i32) {
    %c0_i32 = arith.constant 0 : i32
    %c0_i32_0 = arith.constant 0 : i32
    %c0_i32_1 = arith.constant 0 : i32
    return %c0_i32, %c0_i32_0 : i32, i32
  }
  func.func @transform_4(%arg0: i32) -> i32 {
    %c0_i32 = arith.constant 0 : i32
    %c0_i32_0 = arith.constant 0 : i32
    return %c0_i32 : i32
  }
  func.func @transform_5(%arg0: i32) -> (i32, i32, i32) {
    %c0_i32 = arith.constant 0 : i32
    %c0_i32_0 = arith.constant 0 : i32
    %c0_i32_1 = arith.constant 0 : i32
    return %arg0, %c0_i32, %c0_i32_0 : i32, i32, i32
  }
}

</mosaic_0001>

<bundles_post_ra>
// kernel: self_attention.1
= control target key start
LH: loop header
LB: loop body
LE: loop exit
PB: predicated region body
PF: predicated region fallthrough
CT: control target
= control target key end

     0   :  { %s929_s0 = inlined_call_operand.hbm [shape: f32[2,8,32], index: 0, kind: input, shape index: {}]   ;;  %s930_s1 = inlined_call_operand.hbm [shape: f32[32,32], index: 1, kind: input, shape index: {}]   ;;  %s931_s2 = inlined_call_operand.vmem [shape: f32[1,32], index: 2, kind: input, shape index: {}]   ;;  %s932_s3 = inlined_call_operand.vmem [shape: f32[1,32], index: 3, kind: input, shape index: {}]   ;;  %s933_s4 = inlined_call_operand.<no memory space> [shape: f32[1], index: 4, kind: input, shape index: {}]   ;;  %s934_s5 = inlined_call_operand.vmem [shape: f32[2,1,256], index: 5, kind: output, shape index: {}]  }
   0x1   :  { %10 = sst [smem:[#allocation2]] %s933_s4 }
   0x2   :  { %11 = vsyncpa [#allocation4], 0 }
   0x3   :  { %13 = vsyncpa [#allocation4 + $0x1], 0 }
   0x4   :  { %14 = vsyncpa [#allocation6], 0  ;;  %s790_s20 = smov 0   ;;  %s792_s21 = smov 0  }
   0x5   :  { %s794_s22 = smov 0   ;;  %s796_s23 = smov 0  }
   0x6 LB: > { %s809_s4 = sadd.s32 4294967295, %s743_s23   ;;  %p40_p0 = scmp.ne.s32.totalorder %s735_s21, %s731_s20  ;;  %s743_s23 = sphi %s796_s23, %s949_s23   ;;  %s739_s22 = sphi %s794_s22, %s948_s22   ;;  %s735_s21 = sphi %s792_s21, %s947_s21   ;;  %s731_s20 = sphi %s790_s20, %s946_s20  }
   0x7   : > { %p935_p1 = scmp.eq.s32.totalorder %s809_s4, 0  ;;  %p555_p2 = scmp.ge.s32.totalorder %s743_s23, 1 }
   0x8   : > { %p161_p3 = scmp.lt.s32.totalorder %s743_s23, 3  ;;  %s745_s26 = smov [#allocation5]  }
   0x9   : > { %p817_p4 = por %p935_p1, %p40_p0  ;;  %s173_s27 = sshll.u32 %s745_s26, 4  ;;  %s174_s27 = int_to_ptr.vmem [resolvable:$true] %s173_s27 }
   0xa   : > { %p821_p5 = pnand %p555_p2, %p161_p3  ;;  %s834_s29 = sadd.s32 1, %s743_s23  }
   0xb   : > { %s938_s24 = scalar_select %p817_p4, 1, 0 }
   0xc   : > { %s939_s25 = scalar_select %p821_p5, 1, 0 }
   0xd   : > { %p591_p6 = pneg %p821_p5  ;;  %s27_s30 = sadd.s32 1, %s739_s22 }
   0xe   : > { %s24_s6 = ssub.s32 %s743_s23, %s834_s29  ;;  %s662_s7 = scalar_lea.vmem %s174_s27, 512 }
   0xf   : > { %p829_p7 = pnand %p591_p6, %p935_p1  ;;  %p663_p9 = scmp.ne.s32.totalorder %s174_s27, %s662_s7 }
  0x10   : > { %p670_p12 = scmp.lt.s32.totalorder %s174_s27, %s174_s27  ;;  %p671_p13 = scmp.lt.s32.totalorder %s662_s7, %s662_s7 }
  0x11   : > { %p653_p8 = pneg %p829_p7 }
  0x12   : > { %p672_p0 = por %p671_p13, %p670_p12 }
  0x13   : > { %p665_p10 = pnand %p663_p9, %p653_p8 }
  0x15   : > { %p666_p11 = pneg %p665_p10 }
  0x17   : > { %p673_p2 = pnand %p672_p0, %p666_p11 }
  0x19   : > { %676 = shalt.err (!%p673_p2)
}
  0x1a   : > { %s746_s8 = smov 128   ;;  %s747_s9 = smov 8  }
  0x1b   : > { %594 = dma.hbm_to_vmem [thread:$0]  (!%p829_p7), %s930_s1, 512, %s174_s27, [#allocation6], %s746_s8, %s746_s8, %s747_s9  }
  0x1c   : > { %p25_p3 = scmp.eq.s32.totalorder %s24_s6, 0  ;;  %p34_p6 = scmp.ne.s32.totalorder %s739_s22, %s735_s21 }
  0x1d   : > { %p35_p8 = scmp.eq.s32.totalorder %s743_s23, 0  ;;  %p600_p9 = scmp.lt.s32.totalorder %s743_s23, 2 }
  0x1e   : > { %s851_s12 = scalar_select %p25_p3, %s739_s22, %s27_s30  }
  0x1f   : > { %p36_p10 = por %p35_p8, %p34_p6  ;;  %s196_s13 = sand.u32 1, %s739_s22  }
  0x20   : > { %s558_s14 = sshll.u32 %s196_s13, 3  ;;  %s559_s15 = sshll.u32 %s743_s23, 7 }
  0x21   : > { %s858_s18 = scalar_lea.hbm %s929_s0, %s559_s15  ;;  %s200_s19 = scalar_lea.vmem [#allocation3], %s558_s14 }
  0x22   : > { %s207_s20 = sshll.u32 %s200_s19, 4  ;;  %p860_p7 = pnand %p600_p9, %p36_p10  ;;  %s208_s20 = int_to_ptr.vmem [resolvable:$true] %s207_s20 }
  0x23   : > { %s197_s27 = scalar_lea.sflag [#allocation4], %s196_s13  ;;  %s677_s28 = scalar_lea.hbm %s858_s18, 128 }
  0x24   : > { %p678_p11 = scmp.ne.s32.totalorder %s858_s18, %s677_s28  ;;  %p679_p12 = pneg %p860_p7 }
  0x25   : > { %s682_s6 = scalar_lea.hbm %s929_s0, 256  ;;  %p683_p2 = scmp.lt.s32.totalorder %s858_s18, %s929_s0 }
  0x26   : > { %p680_p13 = pnand %p679_p12, %p678_p11  ;;  %p684_p3 = scmp.lt.s32.totalorder %s682_s6, %s677_s28 }
  0x28   : > { %p681_p0 = pneg %p680_p13  ;;  %p685_p6 = por %p684_p3, %p683_p2 }
  0x2a   : > { %p686_p8 = pnand %p685_p6, %p681_p0 }
  0x2c   : > { %689 = shalt.err (!%p686_p8)
}
  0x2d   : > { %s690_s9 = scalar_lea.vmem %s208_s20, 128  ;;  %s748_s10 = smov [#allocation3]  }
  0x2e   : > { %p691_p9 = scmp.ne.s32.totalorder %s208_s20, %s690_s9  ;;  %s695_s11 = sshll.u32 %s748_s10, 4  ;;  %s696_s11 = int_to_ptr.vmem [resolvable:$false] %s695_s11 }
  0x2f   : > { %s697_s13 = scalar_lea.vmem %s696_s11, 256  ;;  %p698_p11 = scmp.lt.s32.totalorder %s208_s20, %s696_s11 }
  0x30   : > { %p693_p10 = pnand %p691_p9, %p679_p12  ;;  %p699_p13 = scmp.lt.s32.totalorder %s697_s13, %s690_s9 }
  0x32   : > { %p694_p1 = pneg %p693_p10  ;;  %p700_p4 = por %p699_p13, %p698_p11 }
  0x34   : > { %p701_p5 = pnand %p700_p4, %p694_p1 }
  0x36   : > { %704 = shalt.err (!%p701_p5)
}
  0x37   : > { %598 = dma.hbm_to_vmem [thread:$0]  (!%p860_p7), %s858_s18, 128, %s208_s20, %s197_s27  }
  0x38   : > { %p942_p0 = scmp.ne.s32.totalorder %s939_s25, 0 }
  0x39   : > { %s218_s14 = sand.u32 (!%p942_p0), 1, %s735_s21   ;;  %p943_p12 = scmp.ne.s32.totalorder (!%p942_p0), %s938_s24, 0 }
  0x3a   : > { %216 = sbr.rel (%p942_p0) target bundleno = 633 (0x279), region = 40  ;;  %s561_s15 = sshll.u32 (!%p942_p0), %s218_s14, 3 }
  0x3b   : > { %s219_s16 = scalar_lea.sflag (!%p942_p0), [#allocation4], %s218_s14  ;;  %s222_s17 = scalar_lea.vmem (!%p942_p0), [#allocation3], %s561_s15 }
  0x3f   : > { %722 = dma.done.wait (%p943_p12), %s219_s16, 128  }
  0x40   : > { %724 = vsyncadd (%p943_p12), %s219_s16, 4294967168  ;;  %p944_p1 = scmp.eq.s32.totalorder %s809_s4, 0 }
  0x42   : > { %726 = dma.done.wait (%p944_p1), [#allocation6], 512   ;;  %p945_p4 = pmov %p944_p1 }
  0x43   : > { %v749_v0 = vmov 0.0   ;;  %vm750_vm0 = vmmov 0   ;;  %v260_v1 = vld [vmem:[#allocation5 + $0x18] sm:$0xff]  ;;  %v259_v2 = vld [vmem:[#allocation5 + $0x10] sm:$0xff]  ;;  %v258_v3 = vld [vmem:[#allocation5 + $0x8] sm:$0xff]  ;;  %vm268_vm1 = vcmask 261120   ;;  %v379_v34 = vlaneseq }
  0x44   : > { %728 = vsyncadd (%p945_p4), [#allocation6], 4294966784  ;;  %574 = vmatprep.subr.mxu0 %v749_v0  ;;  %582 = vmatprep.mubr.msk.f32.mxu0 %vm750_vm0, %v749_v0  ;;  %v257_v4 = vld [vmem:[#allocation5] sm:$0xff]  ;;  %v256_v5 = vld [vmem:[%s222_s17] sm:$0xff]  ;;  %s354_s20 = sld [smem:[#allocation2]]  ;;  %s753_s26 = smov 32  }
  0x45   : > { %575 = vmatpush3.msra.mxu0 %v260_v1  ;;  %v564_v6 = vld [vmem:[%s931_s2] ss:$0 sm:$0xff]  ;;  %v751_v32 = vmov 1983009808   ;;  %v752_v35 = vmov 1934713408  }
  0x46   : > { %576 = vmatprep.subr.mxu0 %v749_v0  ;;  %v566_v10 = vld [vmem:[%s932_s3] ss:$0 sm:$0xff]  ;;  %v377_v33 = vunpack.c.l.s4 %v751_v32  ;;  %v392_v36 = vunpack.c.l.s4 %v752_v35  ;;  %v380_v38 = vshrl.u32 %v379_v34, 7  ;;  %s754_s27 = smov 64   ;;  %s755_s28 = smov 96   ;;  %vm449_vm2 = vcmask 523264  }
  0x47   : > { %577 = vmatpush3.msra.mxu0 %v259_v2  ;;  %v756_v61 = vmov 1966171168   ;;  %p252_p5 = scmp.lt.s32.totalorder %s809_s4, 1  ;;  %vm451_vm3 = vcmask 785408   ;;  %vm476_vm4 = vcmp.lt.s32.totalorder %v379_v34, 256 }
  0x48   : > { %578 = vmatprep.subr.mxu0 %v749_v0  ;;  %v378_v37 = vunpack.c.0.s8 %v377_v33  ;;  %v393_v39 = vunpack.c.0.s8 %v392_v36  ;;  %v460_v62 = vunpack.c.l.s4 %v756_v61 }
  0x49   : > { %579 = vmatpush3.msra.mxu0 %v258_v3  ;;  %s951_s4 = smov (!%p252_p5, %s809_s4), 1 }
  0x4a   : > { %580 = vmatprep.subr.mxu0 %v749_v0  ;;  %v355_v14 = vstv %s354_s20  ;;  %v381_v42 = vsub.s32 %v378_v37, %v380_v38  ;;  %v396_v44 = vsub.s32 %v393_v39, %v380_v38  ;;  %v461_v2 = vunpack.c.0.s8 %v460_v62  ;;  %s563_s23 = sshll.u32 %s951_s4, 1 }
  0x4b   : > { %581 = vmatpush3.msra.mxu0 %v257_v4  ;;  %s255_s7 = scalar_lea.vmem %s934_s5, %s563_s23 }
  0x4c   : > { %583 = vmatmul.mubr.msk.f32.vlgmr.msra.gmra.mxu0 %vm268_vm1, %v256_v5 }
 0x10c   : > { %v338_v7 = vpop.f32.mrf.mxu0 }
 0x10d   : > { %v339_v8 = vadd.f32 %v564_v6, %v338_v7 }
 0x10e   : > { %v584_v9 = vpop.f32.mrf.mxu0 }
 0x10f   : > { %645 = vtanh.f32 %v339_v8 }
 0x11c   : > { %v646_v11 = vpop.eup %645 }
 0x11d   : > { %v350_v12 = vmul.f32 %v646_v11, %v566_v10 }
 0x11f   : > { %v351_v13 = vsel %vm268_vm1, %v350_v12, 0.0 }
 0x120   : > { %352 = vadd.xlane.f32.xlu0 %v351_v13 }
 0x1a9   : > { %v353_v15 = vpop.xlane.xlu0 %352 }
 0x1aa   : > { %v356_v16 = vadd.f32 %v355_v14, %v353_v15 }
 0x1ac   : > { %v357_v17 = vrot.slane %v356_v16, 4 }
 0x1ae   : > { %v358_v18 = vmax.f32 %v356_v16, %v357_v17 }
 0x1b0   : > { %v359_v19 = vrot.slane %v358_v18, 2 }
 0x1b2   : > { %v360_v20 = vmax.f32 %v358_v18, %v359_v19 }
 0x1b4   : > { %v361_v21 = vrot.slane %v360_v20, 1 }
 0x1b6   : > { %v362_v22 = vmax.f32 %v360_v20, %v361_v21 }
 0x1b8   : > { %v363_v23 = vsub.f32 %v356_v16, %v362_v22 }
 0x1ba   : > { %v364_v24 = vmul.f32 1.442695, %v363_v23 }
 0x1bc   : > { %647 = vpow2.f32 %v364_v24 }
 0x1c9   : > { %v648_v25 = vpop.eup %647 }
 0x1ca   : > { %v366_v26 = vrot.slane %v648_v25, 4 }
 0x1cc   : > { %v367_v27 = vadd.f32 %v648_v25, %v366_v26 }
 0x1ce   : > { %v368_v28 = vrot.slane %v367_v27, 2 }
 0x1d0   : > { %v369_v29 = vadd.f32 %v368_v28, %v367_v27 }
 0x1d2   : > { %v370_v30 = vrot.slane %v369_v29, 1 }
 0x1d4   : > { %v371_v31 = vadd.f32 %v370_v30, %v369_v29 }
 0x1d6   : > { %649 = vrcp.f32 %v371_v31 }
 0x1e3   : > { %v650_v40 = vpop.eup %649 }
 0x1e4   : > { %v373_v41 = vmul.f32 %v650_v40, %v648_v25 }
 0x1e6   : > { %v374_v43 = vmul.f32 %v373_v41, %v256_v5 }
 0x1e8   : > { %v382_v45 = vrot.slane %v374_v43, %v381_v42  ;;  %v375_v46 = vcombine.high %v374_v43, %v749_v0 }
 0x1ea   : > { %v397_v47 = vrot.slane %v382_v45, %v396_v44  ;;  %v390_v48 = vcombine.high %v382_v45, %v749_v0  ;;  %v389_v49 = vrot.slane %v375_v46, %v381_v42 }
 0x1ec   : > { %v420_v50 = vcombine.high %v397_v47, %v749_v0  ;;  %v404_v51 = vrot.slane %v390_v48, %v396_v44  ;;  %v412_v52 = vrot.slane %v389_v49, %v396_v44  ;;  %v405_v54 = vcombine.high %v389_v49, %v749_v0 }
 0x1ee   : > { %425 = vrot.lane.b32.xlu0 %v420_v50, %s753_s26  ;;  %429 = vrot.lane.b32.xlu1 %v404_v51, %s754_s27  ;;  %v422_v53 = vcombine.high %v412_v52, %v749_v0  ;;  %v419_v55 = vrot.slane %v405_v54, %v396_v44  ;;  %v421_v56 = vcombine.high %v404_v51, %v749_v0 }
 0x1f0   : > { %v423_v57 = vcombine.high %v419_v55, %v749_v0  ;;  %v464_v0 = vsub.s32 %v461_v2, %v380_v38 }
 0x1f2   : > { %437 = vrot.lane.b32.xlu1 %v422_v53, %s753_s26 }
 0x1f6   : > { %441 = vrot.lane.b32.xlu1 %v419_v55, %s754_s27 }
 0x1fa   : > { %433 = vrot.lane.b32.xlu1 %v421_v56, %s755_s28 }
 0x1fe   : > { %445 = vrot.lane.b32.xlu1 %v423_v57, %s755_s28 }
 0x260   : > { %v430_v58 = vpop.permute.xlu1 %429  ;;  %v426_v63 = vpop.permute.xlu0 %425 }
 0x261   : > { %v448_v3 = vsel %vm268_vm1, %v397_v47, %v426_v63 }
 0x262   : > { %v450_v5 = vsel %vm449_vm2, %v448_v3, %v430_v58 }
 0x264   : > { %v438_v59 = vpop.permute.xlu1 %437 }
 0x265   : > { %v453_v4 = vsel %vm268_vm1, %v412_v52, %v438_v59 }
 0x268   : > { %v442_v60 = vpop.permute.xlu1 %441 }
 0x269   : > { %v454_v6 = vsel %vm449_vm2, %v453_v4, %v442_v60 }
 0x26c   : > { %v434_v1 = vpop.permute.xlu1 %433 }
 0x26d   : > { %v452_v8 = vsel %vm451_vm3, %v450_v5, %v434_v1 }
 0x270   : > { %v446_v7 = vpop.permute.xlu1 %445 }
 0x271   : > { %v455_v9 = vsel %vm451_vm3, %v454_v6, %v446_v7 }
 0x272   : > { %v458_v10 = vcombine.low %v452_v8, %v455_v9 }
 0x274   : > { %v465_v11 = vrot.slane %v458_v10, %v464_v0 }
 0x276   : > { %v472_v12 = vrot.slane %v465_v11, %v464_v0 }
 0x278   : > { %478 = vst.msk [vmem:[%s255_s7] sm:$0x3] %vm476_vm4, %v472_v12 }
 0x279 PF: > { %p17_p7 = scmp.ge.s32.totalorder %s834_s29, 4   ;;  %s946_s20 = smov %s735_s21 }
 0x27a   : > { %s947_s21 = smov %s739_s22  ;;  %s948_s22 = smov %s851_s12 }
 0x27b   : > { %s949_s23 = smov %s834_s29  ;;  %19 = sbr.rel (!%p17_p7) target bundleno = 6 (0x6), region = 84 }
 0x280   :  { %498 = vsyncpa [#allocation4], 1 }
 0x281   :  { %500 = vsyncpa [#allocation4 + $0x1], 1 }
 0x282   :  { %501 = vsyncpa [#allocation6], 1 }

</bundles_post_ra>
